<compile_context>
chip_gen: v6e
topology: v6e:2x2x1
jax: 0.10.0
libtpu: 0.0.40
codegen_flags: <defaults>
</compile_context>

<pallas_src>
import jax
import jax.numpy as jnp
from jax.experimental import pallas as pl
from jax.experimental.pallas import tpu as pltpu


def attn_general_kernel(h_ref, w_ref, enc_ref, out_ref):
    """softmax_l( (h[b] @ W) . enc[l, b] ) for one batch block.

    h_ref:   (Bt, H)      decoder hidden-state slice
    w_ref:   (H, H)       attn Linear weight, PyTorch (out, in) layout
    enc_ref: (L, Bt, H)   encoder outputs, original seq-major layout
    out_ref: (Bt, L)      attention weights (f32)
    """
    h = h_ref[...].astype(jnp.float32)
    w = w_ref[...].astype(jnp.float32)

    # Fold the Linear into the hidden vector: one small MXU GEMM per block.
    # (The Linear bias contributes h.bias, constant over L -> cancels in the
    # row softmax, so it is dropped exactly.)
    hp = jnp.dot(h, w, preferred_element_type=jnp.float32)            # (Bt, H)

    # energy[l, b] = sum_h enc[l, b, h] * hp[b, h].
    # The big tile is NOT explicitly upcast: promotion happens per-vreg in the
    # multiply, so only one full-size copy of the tile lives in VMEM.  Kept as
    # VPU multiply + lane reduction (kernel is HBM-bandwidth bound).
    # TODO(synk): if a bundle dump ever shows the XLU reduce binding instead of
    # DMA, move this contraction onto the idle MXU via lax.dot_general.
    energy_lb = jnp.sum(enc_ref[...] * hp[None, :, :], axis=-1)       # (L, Bt)

    # One small XLU transpose so the output block is (Bt, L): batch rows on the
    # sublane axis, the (always-full) L dim on the lane axis.
    energy = energy_lb.T                                              # (Bt, L)

    # Row softmax over the sequence axis; exact normalization.
    m = jnp.max(energy, axis=-1, keepdims=True)
    e = jnp.exp(energy - m)
    s = jnp.sum(e, axis=-1, keepdims=True)
    out_ref[...] = (e / s).astype(out_ref.dtype)


def _vmem_capacity_bytes():
    """Physical VMEM per TensorCore; conservative fallback if unavailable."""
    try:
        return int(pltpu.get_tpu_info().vmem_capacity_bytes)
    except Exception:
        return 64 * 1024 * 1024


def _pick_block_b(B, L, H, itemsize, budget_bytes, min_steps=1):
    """Batch block size: largest 8-multiple whose encoder tile fits the
    per-buffer budget (tiles are double-buffered by the pipeline).  Tiny
    batches use the full batch (full-dim blocks are always layout-legal)."""
    if B <= 8:
        return B
    block = 8
    for cand in (4096, 2048, 1024, 512, 256, 128, 64, 32, 16, 8):
        if cand <= B and cand * L * H * itemsize <= budget_bytes:
            block = cand
            break
    # On multi-TensorCore chips make sure the grid has >= min_steps steps so
    # dimension_semantics=("parallel",) can actually shard across cores.
    while min_steps > 1 and (B + block - 1) // block < min_steps and block > 8:
        block //= 2
    return block


def attn_general(hidden, encoder_outputs, W, bias):
    """hidden: (1, B, H); encoder_outputs: (L, B, H); W: (H, H); bias: (H,).

    Returns (B, 1, L) attention weights, matching Attn.forward('general')."""
    del bias  # h . bias is constant over L -> cancels exactly under row softmax.

    L, B, H = encoder_outputs.shape
    h2d = hidden.reshape(B, H)

    itemsize = jnp.dtype(encoder_outputs.dtype).itemsize
    vmem_cap = _vmem_capacity_bytes()
    small_vmem = vmem_cap < 96 * 1024 * 1024        # 64-MiB-VMEM (2-TC) chips
    budget = (8 if small_vmem else 24) * 1024 * 1024
    vmem_limit = int((vmem_cap * 3) // 4)

    block_b = _pick_block_b(B, L, H, itemsize, budget,
                            min_steps=2 if small_vmem else 1)
    n_blocks = (B + block_b - 1) // block_b
    # TODO(synk): if even a block_b=8 encoder tile exceeds the budget (huge
    # L*H), add L-tiling with an online-softmax accumulator.
    # TODO(synk): for very large H, pass W as bf16 (MXU-native) or K-tile it so
    # the resident (H, H) block cannot blow the VMEM limit.

    cost = pl.CostEstimate(
        flops=2 * B * H * H + 2 * B * L * H,
        transcendentals=B * L,
        bytes_accessed=(encoder_outputs.size * itemsize
                        + h2d.size * jnp.dtype(h2d.dtype).itemsize
                        + W.size * jnp.dtype(W.dtype).itemsize
                        + B * L * 4),
    )

    attn_weights = pl.pallas_call(
        attn_general_kernel,
        out_shape=jax.ShapeDtypeStruct((B, L), jnp.float32),
        grid=(n_blocks,),
        in_specs=[
            pl.BlockSpec((block_b, H), lambda i: (i, 0)),        # hidden slice
            pl.BlockSpec((H, H), lambda i: (0, 0)),              # W (resident)
            pl.BlockSpec((L, block_b, H), lambda i: (0, i, 0)),  # enc, blocked on batch axis
        ],
        out_specs=pl.BlockSpec((block_b, L), lambda i: (i, 0)),
        compiler_params=pltpu.CompilerParams(
            dimension_semantics=("parallel",),                   # shard batch blocks across TCs
            vmem_limit_bytes=vmem_limit,
        ),
        cost_estimate=cost,
    )(h2d, W, encoder_outputs)

    return attn_weights[:, None, :]                              # (B, 1, L)


def attn_general_ref(hidden, encoder_outputs, W, bias):
    """Pure-JAX reference matching the PyTorch loop (bias included — proves the
    bias-drop in the kernel is exact under the softmax)."""
    L, B, H = encoder_outputs.shape
    h = hidden.reshape(B, H)
    proj = jnp.einsum('lbh,kh->lbk', encoder_outputs, W) + bias        # (L, B, H)
    energy = jnp.einsum('bh,lbh->bl', h, proj)                         # (B, L)
    return jax.nn.softmax(energy, axis=-1)[:, None, :]


if __name__ == "__main__":
    # Small shapes implied by the forward pass: seq L=8, batch B=2, hidden H=32.
    L, B, H = 8, 2, 32
    key = jax.random.PRNGKey(0)
    k1, k2, k3, k4 = jax.random.split(key, 4)

    hidden = jax.random.normal(k1, (1, B, H), dtype=jnp.float32)
    encoder_outputs = jax.random.normal(k2, (L, B, H), dtype=jnp.float32)

    # Deterministic parameters for nn.Linear(hidden_size, hidden_size).
    W = jax.random.normal(k3, (H, H), dtype=jnp.float32) * (1.0 / jnp.sqrt(H))
    bias = jax.random.normal(k4, (H,), dtype=jnp.float32) * 0.01

    out = attn_general(hidden, encoder_outputs, W, bias)
    out = jax.block_until_ready(out)

    ref = attn_general_ref(hidden, encoder_outputs, W, bias)
    assert out.shape == (B, 1, L), out.shape
    assert jnp.allclose(out, ref, atol=1e-4, rtol=1e-4), "mismatch vs reference"

    # TODO(synk): 'dot' and 'concat' scoring methods not implemented; 'general'
    # (the matmul hot path) is the one realized in the Pallas kernel.
    print("KERNEL_OK")
</pallas_src>

<mosaic_0001>
module attributes {stable_mosaic.version = 11 : i64} {
  func.func @attn_general_kernel(%arg0: i32, %arg1: memref<2x32xf32, #tpu.memory_space<vmem>>, %arg2: memref<32x32xf32, #tpu.memory_space<vmem>>, %arg3: memref<8x2x32xf32, #tpu.memory_space<vmem>>, %arg4: memref<2x8xf32, #tpu.memory_space<vmem>>) attributes {dimension_semantics = [#tpu.dimension_semantics<parallel>], iteration_bounds = array<i64: 1>, scalar_prefetch = 0 : i64, scratch_operands = 0 : i64, tpu.core_type = #tpu.core_type<tc>, window_params = [{transform_indices = @transform_0, window_bounds = array<i64: 2, 32>}, {pipeline_mode = #tpu.pipeline_mode<synchronous>, transform_indices = @transform_1, window_bounds = array<i64: 32, 32>}, {transform_indices = @transform_2, window_bounds = array<i64: 8, 2, 32>}, {transform_indices = @transform_3, window_bounds = array<i64: 2, 8>}]} {
    %c0 = arith.constant 0 : index
    %c0_0 = arith.constant 0 : index
    %0 = vector.load %arg1[%c0, %c0_0] : memref<2x32xf32, #tpu.memory_space<vmem>>, vector<2x32xf32>
    %c0_1 = arith.constant 0 : index
    %c0_2 = arith.constant 0 : index
    %1 = vector.load %arg2[%c0_1, %c0_2] : memref<32x32xf32, #tpu.memory_space<vmem>>, vector<32x32xf32>
    %cst = arith.constant dense<0.000000e+00> : vector<2x32xf32>
    %2 = tpu.matmul %0, %1, %cst {dimension_numbers = #tpu.dot_dimension_numbers<[1], [0], [0], [1], [0, 0, 1, 1], [], []>} : vector<2x32xf32>, vector<32x32xf32>, vector<2x32xf32> -> vector<2x32xf32>
    %c0_3 = arith.constant 0 : index
    %c0_4 = arith.constant 0 : index
    %c0_5 = arith.constant 0 : index
    %3 = vector.load %arg3[%c0_3, %c0_4, %c0_5] : memref<8x2x32xf32, #tpu.memory_space<vmem>>, vector<8x2x32xf32>
    %4 = vector.shape_cast %2 : vector<2x32xf32> to vector<1x2x32xf32>
    %5 = vector.broadcast %4 : vector<1x2x32xf32> to vector<8x2x32xf32>
    %6 = arith.mulf %3, %5 : vector<8x2x32xf32>
    %cst_6 = arith.constant dense<0.000000e+00> : vector<8x2xf32>
    %7 = vector.multi_reduction <add>, %6, %cst_6 [2] : vector<8x2x32xf32> to vector<8x2xf32>
    %8 = tpu.transpose %7, [1, 0] : vector<8x2xf32> -> vector<2x8xf32>
    %cst_7 = arith.constant dense<0xFF800000> : vector<2xf32>
    %9 = vector.multi_reduction <maximumf>, %8, %cst_7 [1] : vector<2x8xf32> to vector<2xf32>
    %10 = vector.shape_cast %9 : vector<2xf32> to vector<2x1xf32>
    %11 = vector.broadcast %10 : vector<2x1xf32> to vector<2x8xf32>
    %12 = arith.subf %8, %11 : vector<2x8xf32>
    %13 = math.exp %12 : vector<2x8xf32>
    %cst_8 = arith.constant dense<0.000000e+00> : vector<2xf32>
    %14 = vector.multi_reduction <add>, %13, %cst_8 [1] : vector<2x8xf32> to vector<2xf32>
    %15 = vector.shape_cast %14 : vector<2xf32> to vector<2x1xf32>
    %16 = vector.broadcast %15 : vector<2x1xf32> to vector<2x8xf32>
    %17 = arith.divf %13, %16 : vector<2x8xf32>
    %c0_9 = arith.constant 0 : index
    %c0_10 = arith.constant 0 : index
    %18 = vector.load %arg4[%c0_9, %c0_10] : memref<2x8xf32, #tpu.memory_space<vmem>>, vector<2x8xf32>
    tpu.vector_store %arg4[%c0_9, %c0_10], %17 {strides = array<i32>} : memref<2x8xf32, #tpu.memory_space<vmem>>, vector<2x8xf32>,
    return
  }
  func.func @transform_0(%arg0: i32) -> (i32, i32) {
    %c0_i32 = arith.constant 0 : i32
    %c0_i32_0 = arith.constant 0 : i32
    return %arg0, %c0_i32 : i32, i32
  }
  func.func @transform_1(%arg0: i32) -> (i32, i32) {
    %c0_i32 = arith.constant 0 : i32
    %c0_i32_0 = arith.constant 0 : i32
    %c0_i32_1 = arith.constant 0 : i32
    return %c0_i32, %c0_i32_0 : i32, i32
  }
  func.func @transform_2(%arg0: i32) -> (i32, i32, i32) {
    %c0_i32 = arith.constant 0 : i32
    %c0_i32_0 = arith.constant 0 : i32
    %c0_i32_1 = arith.constant 0 : i32
    return %c0_i32, %arg0, %c0_i32_0 : i32, i32, i32
  }
  func.func @transform_3(%arg0: i32) -> (i32, i32) {
    %c0_i32 = arith.constant 0 : i32
    %c0_i32_0 = arith.constant 0 : i32
    return %arg0, %c0_i32 : i32, i32
  }
}

</mosaic_0001>

<bundles_post_ra>
// kernel: tpu_custom_call.1
= control target key start
LH: loop header
LB: loop body
LE: loop exit
PB: predicated region body
PF: predicated region fallthrough
CT: control target
= control target key end

     0   :  { %8 = vsyncpa [#allocation3], 0  ;;  %s462_s0 = inlined_call_operand.hbm [shape: f32[2,32], index: 0, kind: input, shape index: {}]   ;;  %s463_s1 = inlined_call_operand.hbm [shape: f32[32,32], index: 1, kind: input, shape index: {}]   ;;  %s464_s2 = inlined_call_operand.hbm [shape: f32[8,2,32], index: 2, kind: input, shape index: {}]   ;;  %s465_s3 = inlined_call_operand.hbm [shape: f32[2,8], index: 3, kind: output, shape index: {}]  }
   0x1   :  { %9 = vsyncpa [#allocation6], 0 }
   0x2   :  { %10 = vsyncpa [#allocation4], 0  ;;  %s409_s12 = smov [#allocation5]  }
   0x3   :  { %s26_s13 = sshll.u32 %s409_s12, 4  ;;  %s27_s13 = int_to_ptr.vmem [resolvable:$true] %s26_s13 }
   0x4   :  { %s331_s14 = scalar_lea.vmem %s27_s13, 512  ;;  %p336_p1 = scmp.lt.s32.totalorder %s27_s13, %s27_s13 }
   0x5   :  { %p332_p0 = scmp.ne.s32.totalorder %s27_s13, %s331_s14  ;;  %p337_p2 = scmp.lt.s32.totalorder %s331_s14, %s331_s14 }
   0x7   :  { %p338_p3 = por %p337_p2, %p336_p1 }
   0x9   :  { %p339_p4 = pnand %p338_p3, %p332_p0 }
   0xb   :  { %342 = shalt.err (!%p339_p4)
}
   0xc   :  { %s410_s15 = smov 128   ;;  %s411_s16 = smov 8  }
   0xd   :  { %32 = dma.hbm_to_vmem [thread:$0]  %s463_s1, 512, %s27_s13, [#allocation6], %s410_s15, %s410_s15, %s411_s16  }
   0xe   :  { %s412_s19 = smov [#allocation2]   ;;  %s413_s21 = smov [#allocation7]  }
   0xf   :  { %s17_s20 = sshll.u32 %s412_s19, 4  ;;  %s38_s22 = sshll.u32 %s413_s21, 4  ;;  %s18_s20 = int_to_ptr.vmem [resolvable:$true] %s17_s20  ;;  %s39_s22 = int_to_ptr.vmem [resolvable:$true] %s38_s22 }
  0x10   :  { %s351_s23 = scalar_lea.vmem %s18_s20, 32  ;;  %p356_p6 = scmp.lt.s32.totalorder %s18_s20, %s18_s20 }
  0x11   :  { %p352_p5 = scmp.ne.s32.totalorder %s18_s20, %s351_s23  ;;  %p357_p7 = scmp.lt.s32.totalorder %s351_s23, %s351_s23 }
  0x13   :  { %p358_p8 = por %p357_p7, %p356_p6 }
  0x15   :  { %p359_p9 = pnand %p358_p8, %p352_p5 }
  0x17   :  { %362 = shalt.err (!%p359_p9)
}
  0x18   :  { %20 = dma.hbm_to_vmem [thread:$0]  %s462_s0, 32, %s18_s20, [#allocation3]  }
  0x19   :  { %s371_s26 = scalar_lea.vmem %s39_s22, 256  ;;  %p376_p11 = scmp.lt.s32.totalorder %s39_s22, %s39_s22 }
  0x1a   :  { %p372_p10 = scmp.ne.s32.totalorder %s39_s22, %s371_s26  ;;  %p377_p12 = scmp.lt.s32.totalorder %s371_s26, %s371_s26 }
  0x1c   :  { %p378_p13 = por %p377_p12, %p376_p11 }
  0x1e   :  { %p379_p0 = pnand %p378_p13, %p372_p10 }
  0x20   :  { %382 = shalt.err (!%p379_p0)
}
  0x21   :  { %s414_s1 = smov 32   ;;  %s415_s27 = smov 2  }
  0x22   :  { %44 = dma.hbm_to_vmem [thread:$0]  %s464_s2, 256, %s39_s22, [#allocation6], %s414_s1, %s414_s1, %s415_s27  }
  0x23   :  { %403 = dma.done.wait [#allocation3], 32  }
  0x24   :  { %404 = vsyncadd [#allocation3], 4294967264 }
  0x25   :  { %405 = dma.done.wait [#allocation6], 768  }
  0x26   :  { %406 = vsyncadd [#allocation6], 4294966528  ;;  %v416_v0 = vmov 0.0   ;;  %vm417_vm0 = vmmov 0   ;;  %v58_v1 = vld [vmem:[#allocation5 + $0x18] sm:$0xff]  ;;  %v57_v2 = vld [vmem:[#allocation5 + $0x10] sm:$0xff]  ;;  %v182_v32 = vlaneseq }
  0x27   :  { %298 = vmatprep.subr.mxu0 %v416_v0  ;;  %306 = vmatprep.mubr.msk.f32.mxu0 %vm417_vm0, %v416_v0  ;;  %v56_v3 = vld [vmem:[#allocation5 + $0x8] sm:$0xff]  ;;  %v55_v4 = vld [vmem:[#allocation5] sm:$0xff]  ;;  %v54_v5 = vld [vmem:[#allocation2] sm:$0x3]  ;;  %vm59_vm1 = vcmask 261120   ;;  %vm149_vm2 = vcmask 254976  }
  0x28   :  { %299 = vmatpush3.msra.mxu0 %v58_v1  ;;  %v135_v6 = vld [vmem:[#allocation7 + $0x4] sm:$0x3]  ;;  %v133_v7 = vld [vmem:[#allocation7] sm:$0x3]  ;;  %v136_v9 = vld [vmem:[#allocation7 + $0x6] sm:$0x3] }
  0x29   :  { %300 = vmatprep.subr.mxu0 %v416_v0  ;;  %v134_v10 = vld [vmem:[#allocation7 + $0x2] sm:$0x3]  ;;  %v138_v18 = vld [vmem:[#allocation7 + $0xa] sm:$0x3]  ;;  %v137_v19 = vld [vmem:[#allocation7 + $0x8] sm:$0x3] }
  0x2a   :  { %301 = vmatpush3.msra.mxu0 %v57_v2  ;;  %v140_v24 = vld [vmem:[#allocation7 + $0xe] sm:$0x3]  ;;  %v139_v25 = vld [vmem:[#allocation7 + $0xc] sm:$0x3]  ;;  %v183_v33 = vand.u32 127, %v182_v32  ;;  %v185_v34 = vshrl.u32 %v182_v32, 7 }
  0x2b   :  { %302 = vmatprep.subr.mxu0 %v416_v0  ;;  %vm216_vm3 = vcmask 1041409   ;;  %vm218_vm4 = vcmask 1042434   ;;  %vm220_vm5 = vcmask 1043459   ;;  %vm222_vm6 = vcmask 1044484   ;;  %s418_s0 = smov [#allocation8]  }
  0x2c   :  { %303 = vmatpush3.msra.mxu0 %v56_v3  ;;  %v186_v37 = vsub.s32 %v183_v33, %v185_v34  ;;  %vm224_vm7 = vcmask 1045509   ;;  %vm226_vm8 = vcmask 1046534   ;;  %vm228_vm9 = vcmask 1047559   ;;  %s282_s2 = sshll.u32 %s418_s0, 4  ;;  %s283_s2 = int_to_ptr.vmem [resolvable:$true] %s282_s2 }
  0x2d   :  { %304 = vmatprep.subr.mxu0 %v416_v0  ;;  %vm263_vm10 = vcmask 58368   ;;  %s383_s30 = scalar_lea.vmem %s283_s2, 32  ;;  %p388_p2 = scmp.lt.s32.totalorder %s283_s2, %s283_s2 }
  0x2e   :  { %305 = vmatpush3.msra.mxu0 %v55_v4  ;;  %p384_p1 = scmp.ne.s32.totalorder %s283_s2, %s383_s30  ;;  %p389_p3 = scmp.lt.s32.totalorder %s383_s30, %s383_s30 }
  0x2f   :  { %307 = vmatmul.mubr.msk.f32.vlgmr.msra.gmra.mxu0 %vm59_vm1, %v54_v5 }
  0x30   :  { %p390_p4 = por %p389_p3, %p388_p2 }
  0x32   :  { %p391_p5 = pnand %p390_p4, %p384_p1 }
  0xef   :  { %v129_v8 = vpop.f32.mrf.mxu0 }
  0xf0   :  { %v143_v11 = vmul.f32 %v135_v6, %v129_v8  ;;  %v141_v12 = vmul.f32 %v133_v7, %v129_v8  ;;  %v144_v16 = vmul.f32 %v136_v9, %v129_v8  ;;  %v142_v17 = vmul.f32 %v134_v10, %v129_v8 }
  0xf1   :  { %v308_v13 = vpop.f32.mrf.mxu0  ;;  %v146_v22 = vmul.f32 %v138_v18, %v129_v8  ;;  %v145_v23 = vmul.f32 %v137_v19, %v129_v8  ;;  %v148_v28 = vmul.f32 %v140_v24, %v129_v8  ;;  %v147_v29 = vmul.f32 %v139_v25, %v129_v8 }
  0xf2   :  { %v156_v14 = vsel %vm149_vm2, %v143_v11, 0.0  ;;  %v150_v15 = vsel %vm149_vm2, %v141_v12, 0.0  ;;  %v159_v20 = vsel %vm149_vm2, %v144_v16, 0.0  ;;  %v153_v21 = vsel %vm149_vm2, %v142_v17, 0.0 }
  0xf3   :  { %157 = vadd.xlane.f32.xlu1 %v156_v14  ;;  %151 = vadd.xlane.f32.xlu0 %v150_v15  ;;  %v165_v26 = vsel %vm149_vm2, %v146_v22, 0.0  ;;  %v162_v27 = vsel %vm149_vm2, %v145_v23, 0.0  ;;  %v171_v30 = vsel %vm149_vm2, %v148_v28, 0.0  ;;  %v168_v31 = vsel %vm149_vm2, %v147_v29, 0.0 }
  0xf7   :  { %160 = vadd.xlane.f32.xlu1 %v159_v20  ;;  %154 = vadd.xlane.f32.xlu0 %v153_v21 }
  0xfb   :  { %166 = vadd.xlane.f32.xlu1 %v165_v26  ;;  %163 = vadd.xlane.f32.xlu0 %v162_v27 }
  0xff   :  { %172 = vadd.xlane.f32.xlu1 %v171_v30  ;;  %169 = vadd.xlane.f32.xlu0 %v168_v31 }
 0x17c   :  { %v158_v35 = vpop.xlane.xlu1 %157  ;;  %v152_v36 = vpop.xlane.xlu0 %151 }
 0x17d   :  { %v187_v40 = vrot.slane %v152_v36, %v186_v37  ;;  %v195_v42 = vrot.slane %v158_v35, %v186_v37 }
 0x180   :  { %v161_v38 = vpop.xlane.xlu1 %160  ;;  %v155_v39 = vpop.xlane.xlu0 %154 }
 0x181   :  { %v191_v41 = vrot.slane %v155_v39, %v186_v37  ;;  %v199_v43 = vrot.slane %v161_v38, %v186_v37 }
 0x183   :  { %v217_v44 = vsel %vm216_vm3, %v191_v41, %v187_v40 }
 0x184   :  { %v219_v45 = vsel %vm218_vm4, %v195_v42, %v217_v44  ;;  %v167_v46 = vpop.xlane.xlu1 %166  ;;  %v164_v47 = vpop.xlane.xlu0 %163 }
 0x185   :  { %v221_v48 = vsel %vm220_vm5, %v199_v43, %v219_v45  ;;  %v203_v49 = vrot.slane %v164_v47, %v186_v37  ;;  %v207_v50 = vrot.slane %v167_v46, %v186_v37 }
 0x187   :  { %v223_v51 = vsel %vm222_vm6, %v203_v49, %v221_v48 }
 0x188   :  { %v173_v52 = vpop.xlane.xlu1 %172  ;;  %v170_v53 = vpop.xlane.xlu0 %169  ;;  %v225_v56 = vsel %vm224_vm7, %v207_v50, %v223_v51 }
 0x189   :  { %v215_v54 = vrot.slane %v173_v52, %v186_v37  ;;  %v211_v55 = vrot.slane %v170_v53, %v186_v37 }
 0x18b   :  { %v227_v57 = vsel %vm226_vm8, %v211_v55, %v225_v56 }
 0x18c   :  { %v229_v58 = vsel %vm228_vm9, %v215_v54, %v227_v57 }
 0x18d   :  { %231 = vxpose.xlu0.b32.start.end [1/1] (short) (narrow) %v229_v58, 8 }
 0x209   :  { %v247_v59 = vpop.trf.xlu0 }
 0x20a   :  { %v264_v60 = vsel %vm263_vm10, %v247_v59, -inf }
 0x20b   :  { %265 = vmax.xlane.f32.xlu1 %v264_v60 }
 0x294   :  { %v266_v61 = vpop.xlane.xlu1 %265 }
 0x295   :  { %v267_v62 = vsub.f32 %v247_v59, %v266_v61 }
 0x297   :  { %v268_v63 = vmul.f32 1.442695, %v267_v62 }
 0x299   :  { %319 = vpow2.f32 %v268_v63 }
 0x2a6   :  { %v320_v0 = vpop.eup %319 }
 0x2a7   :  { %v270_v1 = vsel %vm263_vm10, %v320_v0, 0.0 }
 0x2a8   :  { %271 = vadd.xlane.f32.xlu1 %v270_v1 }
 0x331   :  { %v272_v2 = vpop.xlane.xlu1 %271 }
 0x332   :  { %321 = vrcp.f32 %v272_v2 }
 0x33f   :  { %v322_v3 = vpop.eup %321 }
 0x340   :  { %v274_v4 = vmul.f32 %v322_v3, %v320_v0 }
 0x342   :  { %275 = vst.msk [vmem:[#allocation8] sm:$0x3] %vm263_vm10, %v274_v4 }
 0x343   :  { %394 = shalt.err (!%p391_p5)
}
 0x344   :  { %285 = dma.vmem_to_hbm [thread:$0]  %s283_s2, 32, %s465_s3, [#allocation4]  }
 0x345   :  { %407 = dma.done.wait [#allocation4], 32  }
 0x346   :  { %408 = vsyncadd [#allocation4], 4294967264 }
 0x347   :  { %289 = vsyncpa [#allocation3], 1 }
 0x348   :  { %290 = vsyncpa [#allocation6], 1 }
 0x349   :  { %291 = vsyncpa [#allocation4], 1 }

</bundles_post_ra>
